<compile_context>
chip_gen: v7x
topology: tpu7x:2x2x1
jax: 0.10.0
libtpu: 0.0.40
codegen_flags: <defaults>
</compile_context>

<pallas_src>
import functools

import numpy as np
import jax
import jax.numpy as jnp
from jax.experimental import pallas as pl
from jax.experimental.pallas import tpu as pltpu

LANE = 128        # lane width; per-branch frame tiles are multiples of this
MAX_TILE_F = 512  # upper bound on per-branch frame tile (tile-sweep sweet spot)


# ----------------------------------------------------------------------------
# Deterministic parameter construction (windows, DFT matrices, mel filterbanks)
# ----------------------------------------------------------------------------
def _hz_to_mel(f):
    return 2595.0 * np.log10(1.0 + f / 700.0)


def _mel_to_hz(m):
    return 700.0 * (10.0 ** (m / 2595.0) - 1.0)


def mel_filterbank(n_freqs, f_min, f_max, n_mels, sample_rate):
    """torchaudio-style (htk scale, norm=None) mel filterbank, (n_freqs, n_mels)."""
    all_freqs = np.linspace(0.0, sample_rate / 2.0, n_freqs)
    m_pts = np.linspace(_hz_to_mel(f_min), _hz_to_mel(f_max), n_mels + 2)
    f_pts = _mel_to_hz(m_pts)
    f_diff = f_pts[1:] - f_pts[:-1]
    slopes = f_pts[None, :] - all_freqs[:, None]
    down = -slopes[:, :-2] / f_diff[:-1]
    up = slopes[:, 2:] / f_diff[1:]
    return np.maximum(0.0, np.minimum(down, up)).astype(np.float32)


def dft_matrices(n_fft):
    """Real/imag one-sided DFT matrices, (n_fft, n_fft//2 + 1)."""
    n = np.arange(n_fft)[:, None]
    k = np.arange(n_fft // 2 + 1)[None, :]
    ang = 2.0 * np.pi * n * k / n_fft
    return np.cos(ang).astype(np.float32), (-np.sin(ang)).astype(np.float32)


def hamming_window(n):
    # symmetric (N-1 denominator): matches SEDTransform's wkwargs={"periodic": False}.
    i = np.arange(n)
    return (0.54 - 0.46 * np.cos(2.0 * np.pi * i / (n - 1))).astype(np.float32)


def hann_window(n):             # periodic, torchaudio MelSpectrogram default
    i = np.arange(n)
    return (0.5 - 0.5 * np.cos(2.0 * np.pi * i / n)).astype(np.float32)


def _round_up(x, m):
    return (x + m - 1) // m * m


def _frame_transposed(x, n_fft, hop, f_pad):
    """center=True reflect-padded framing -> (n_fft, f_pad) bf16, frames on the lane axis."""
    pad = n_fft // 2
    xp = jnp.pad(x, (pad, pad), mode="reflect").astype(jnp.bfloat16)
    n_frames = 1 + x.shape[0] // hop
    if n_fft % hop == 0:
        r = n_fft // hop
        # Transpose the small (n_frames-1+r, hop) base ONCE, then stack r column-shifted
        # views of the already-transposed base: r x less data through the XLA transpose
        # than transposing the full (n_frames, n_fft) frame matrix, no gather.
        base = xp[: (n_frames - 1 + r) * hop].reshape(n_frames - 1 + r, hop).T  # (hop, F+r-1)
        frames_t = jnp.concatenate([base[:, j:j + n_frames] for j in range(r)], axis=0)
    else:
        # TODO(synk): hop does not divide n_fft -> gather framing fallback.
        idx = jnp.arange(n_frames)[:, None] * hop + jnp.arange(n_fft)[None, :]
        frames_t = xp[idx].T
    # TODO(synk): could build frame tiles inside the kernel from the raw waveform
    # (resident 1-D VMEM input + strided sublane reads) to drop this HBM pass entirely.
    return jnp.pad(frames_t, ((0, 0), (0, f_pad - n_frames)))   # (n_fft, f_pad)


def _choose_tiling(sed_f, atst_f):
    """Per-branch frame tile widths sharing one grid axis (decoupled padding)."""
    max_f = max(sed_f, atst_f)
    n_tiles = max(1, pl.cdiv(max_f, MAX_TILE_F))
    if max_f >= 2 * LANE:     # enough real frames: keep >=2 grid steps (v7x megacore split)
        n_tiles = max(n_tiles, 2)
    sed_tile = _round_up(pl.cdiv(sed_f, n_tiles), LANE)
    atst_tile = _round_up(pl.cdiv(atst_f, n_tiles), LANE)
    return n_tiles, sed_tile, atst_tile


# ----------------------------------------------------------------------------
# Fused Pallas kernel: both branches, one frame tile per grid step
# ----------------------------------------------------------------------------
def _mel_db_branch(frames_ref, w_ref, mel_ref, out_ref, *, k_pad, amplitude, amin, clamp):
    # frames_ref: (n_fft, tile_f) bf16   w_ref: (2*k_pad, n_fft) bf16 (window folded in)
    # mel_ref:    (n_mels, k_pad) f32    out_ref: (n_mels, tile_f) f32
    ri = jnp.dot(w_ref[...], frames_ref[...], preferred_element_type=jnp.float32)
    re = ri[:k_pad, :]
    im = ri[k_pad:, :]
    power = re * re + im * im                       # (k_pad, tile_f) f32
    spec = jnp.sqrt(power) if amplitude else power  # amplitude vs power spectrogram
    mels = jnp.dot(mel_ref[...], spec,
                   preferred_element_type=jnp.float32)            # (n_mels, tile_f) f32
    mul = 20.0 if amplitude else 10.0
    db = mul * jnp.log10(jnp.maximum(mels, amin))
    if clamp is not None:
        db = jnp.clip(db, clamp[0], clamp[1])
    out_ref[...] = db


def fused_kernel(sed_frames_ref, sed_w_ref, sed_mel_ref,
                 atst_frames_ref, atst_w_ref, atst_mel_ref,
                 sed_out_ref, atst_out_ref, *, sed_k_pad, atst_k_pad):
    # SED: MelSpectrogram(power=1, hamming) -> AmplitudeToDB(amin=1e-5) -> clamp(-50, 80)
    _mel_db_branch(sed_frames_ref, sed_w_ref, sed_mel_ref, sed_out_ref,
                   k_pad=sed_k_pad, amplitude=True, amin=1e-5, clamp=(-50.0, 80.0))
    # ATST: MelSpectrogram(power=2, hann) -> power dB (top_db / minmax applied in epilogue)
    _mel_db_branch(atst_frames_ref, atst_w_ref, atst_mel_ref, atst_out_ref,
                   k_pad=atst_k_pad, amplitude=False, amin=1e-10, clamp=None)


# ----------------------------------------------------------------------------
# ATSTSEDFeatureExtractor forward
# ----------------------------------------------------------------------------
class ATSTSEDFeatureExtractorPallas:
    def __init__(self, config):
        f = config["feats"]
        a = config["atst_feats"]
        self.sed_n_fft, self.sed_hop, self.sed_n_mels = f["n_window"], f["hop_length"], f["n_mels"]
        self.atst_n_fft, self.atst_hop, self.atst_n_mels = a["n_window"], a["hop_length"], a["n_mels"]

        def build_branch(n_fft, window, f_min, f_max, n_mels, sr):
            k = n_fft // 2 + 1
            k_pad = _round_up(k, 16)                     # sublane-friendly freq padding (NOT 128)
            cos, sin = dft_matrices(n_fft)
            # window folded into the DFT matrices; [cos | sin] packed into one matrix
            w = np.zeros((n_fft, 2 * k_pad), np.float32)
            w[:, :k] = cos * window[:, None]
            w[:, k_pad:k_pad + k] = sin * window[:, None]
            mel_t = np.zeros((n_mels, k_pad), np.float32)
            mel_t[:, :k] = mel_filterbank(k, f_min, f_max, n_mels, sr).T
            return (k_pad,
                    jnp.asarray(w.T, jnp.bfloat16),      # (2*k_pad, n_fft) bf16
                    jnp.asarray(mel_t, jnp.float32))     # (n_mels, k_pad)  f32 (no bf16 cast)

        self.sed_k_pad, self.sed_w, self.sed_mel = build_branch(
            self.sed_n_fft, hamming_window(self.sed_n_fft),
            f["f_min"], f["f_max"], f["n_mels"], f["sample_rate"])
        self.atst_k_pad, self.atst_w, self.atst_mel = build_branch(
            self.atst_n_fft, hann_window(self.atst_n_fft),
            a["f_min"], a["f_max"], a["n_mels"], a["sample_rate"])
        # TODO(synk): scaler normtype taken from config as 'minmax'; 'mean'/'standard'
        # would only change the JAX epilogue reduction.

    def __call__(self, mixture):
        t = mixture.shape[0]
        sed_f = 1 + t // self.sed_hop
        atst_f = 1 + t // self.atst_hop
        n_tiles, sed_tile, atst_tile = _choose_tiling(sed_f, atst_f)
        sed_f_pad = n_tiles * sed_tile       # per-branch padding (decoupled)
        atst_f_pad = n_tiles * atst_tile

        sed_frames = _frame_transposed(mixture, self.sed_n_fft, self.sed_hop, sed_f_pad)
        atst_frames = _frame_transposed(mixture, self.atst_n_fft, self.atst_hop, atst_f_pad)

        kernel = functools.partial(fused_kernel,
                                   sed_k_pad=self.sed_k_pad,
                                   atst_k_pad=self.atst_k_pad)

        inputs = (sed_frames, self.sed_w, self.sed_mel,
                  atst_frames, self.atst_w, self.atst_mel)
        flops = 2 * (sed_f_pad * (self.sed_n_fft * 2 * self.sed_k_pad
                                  + self.sed_k_pad * self.sed_n_mels)
                     + atst_f_pad * (self.atst_n_fft * 2 * self.atst_k_pad
                                     + self.atst_k_pad * self.atst_n_mels))
        transcendentals = (sed_f_pad * (self.sed_k_pad + self.sed_n_mels)
                           + atst_f_pad * self.atst_n_mels)
        bytes_accessed = (sum(int(x.size) * x.dtype.itemsize for x in inputs)
                          + 4 * (sed_f_pad * self.sed_n_mels + atst_f_pad * self.atst_n_mels))

        sed_db_pad, atst_db_pad = pl.pallas_call(
            kernel,
            out_shape=(jax.ShapeDtypeStruct((self.sed_n_mels, sed_f_pad), jnp.float32),
                       jax.ShapeDtypeStruct((self.atst_n_mels, atst_f_pad), jnp.float32)),
            grid=(n_tiles,),
            in_specs=[
                pl.BlockSpec((self.sed_n_fft, sed_tile), lambda i: (0, i)),
                pl.BlockSpec((2 * self.sed_k_pad, self.sed_n_fft), lambda i: (0, 0)),   # resident
                pl.BlockSpec((self.sed_n_mels, self.sed_k_pad), lambda i: (0, 0)),      # resident
                pl.BlockSpec((self.atst_n_fft, atst_tile), lambda i: (0, i)),
                pl.BlockSpec((2 * self.atst_k_pad, self.atst_n_fft), lambda i: (0, 0)), # resident
                pl.BlockSpec((self.atst_n_mels, self.atst_k_pad), lambda i: (0, 0)),    # resident
            ],
            out_specs=(
                pl.BlockSpec((self.sed_n_mels, sed_tile), lambda i: (0, i)),
                pl.BlockSpec((self.atst_n_mels, atst_tile), lambda i: (0, i)),
            ),
            compiler_params=pltpu.CompilerParams(
                dimension_semantics=("parallel",),          # frame tiles are independent
                vmem_limit_bytes=32 * 1024 * 1024),         # explicit budget (v7x-safe)
            cost_estimate=pl.CostEstimate(flops=flops,
                                          transcendentals=transcendentals,
                                          bytes_accessed=bytes_accessed),
        )(*inputs)

        # ---- tiny JAX epilogues (global reductions kept out of the tiled kernel) ----
        # SED: TorchScaler('instance', 'minmax', dims=(1,2)) on the (1, n_mels, F) dB feats
        sed_db = sed_db_pad[:, :sed_f]
        mn, mx = jnp.min(sed_db), jnp.max(sed_db)
        sed_feats = ((sed_db - mn) / (mx - mn + 1e-8))[None]              # (1, n_mels, F1)

        # ATST: power-dB top_db=80 clamp + fixed MinMax normalization to [-1, 1]
        atst_db = atst_db_pad[:, :atst_f]
        atst_db = jnp.maximum(atst_db, jnp.max(atst_db) - 80.0)
        lo, hi = -79.6482358, 50.6842
        atst_feats = ((atst_db - lo) / (hi - lo) * 2.0 - 1.0)[None]       # (1, n_mels, F2)
        return sed_feats, atst_feats


# ----------------------------------------------------------------------------
if __name__ == "__main__":
    config = {
        "feats": {
            "sample_rate": 16000,
            "n_window": 256,
            "hop_length": 128,
            "f_min": 0.0,
            "f_max": 8000.0,
            "n_mels": 32,
        },
        "atst_feats": {  # small-shape stand-in for the fixed ATST mel config
            "sample_rate": 16000,
            "n_window": 128,
            "hop_length": 64,
            "f_min": 60.0,
            "f_max": 7800.0,
            "n_mels": 16,
        },
        "scaler": {"normtype": "minmax", "dims": (1, 2)},
    }

    extractor = ATSTSEDFeatureExtractorPallas(config)

    key = jax.random.PRNGKey(0)
    mixture = jax.random.normal(key, (2048,), dtype=jnp.float32)

    sed_feats, atst_feats = extractor(mixture)
    jax.block_until_ready(sed_feats)
    jax.block_until_ready(atst_feats)

    assert sed_feats.shape == (1, 32, 17), sed_feats.shape
    assert atst_feats.shape == (1, 16, 33), atst_feats.shape
    assert bool(jnp.all(jnp.isfinite(sed_feats))) and bool(jnp.all(jnp.isfinite(atst_feats)))
    print("KERNEL_OK")
</pallas_src>

<mosaic_0001>
module attributes {stable_mosaic.version = 11 : i64} {
  func.func @fused_kernel(%arg0: i32, %arg1: memref<256x128xbf16, #tpu.memory_space<vmem>>, %arg2: memref<288x256xbf16, #tpu.memory_space<vmem>>, %arg3: memref<32x144xf32, #tpu.memory_space<vmem>>, %arg4: memref<128x128xbf16, #tpu.memory_space<vmem>>, %arg5: memref<160x128xbf16, #tpu.memory_space<vmem>>, %arg6: memref<16x80xf32, #tpu.memory_space<vmem>>, %arg7: memref<32x128xf32, #tpu.memory_space<vmem>>, %arg8: memref<16x128xf32, #tpu.memory_space<vmem>>) attributes {dimension_semantics = [#tpu.dimension_semantics<parallel>], iteration_bounds = array<i64: 1>, scalar_prefetch = 0 : i64, scratch_operands = 0 : i64, tpu.core_type = #tpu.core_type<tc>, window_params = [{transform_indices = @transform_0, window_bounds = array<i64: 256, 128>}, {pipeline_mode = #tpu.pipeline_mode<synchronous>, transform_indices = @transform_1, window_bounds = array<i64: 288, 256>}, {pipeline_mode = #tpu.pipeline_mode<synchronous>, transform_indices = @transform_2, window_bounds = array<i64: 32, 144>}, {transform_indices = @transform_3, window_bounds = array<i64: 128, 128>}, {pipeline_mode = #tpu.pipeline_mode<synchronous>, transform_indices = @transform_4, window_bounds = array<i64: 160, 128>}, {pipeline_mode = #tpu.pipeline_mode<synchronous>, transform_indices = @transform_5, window_bounds = array<i64: 16, 80>}, {transform_indices = @transform_6, window_bounds = array<i64: 32, 128>}, {transform_indices = @transform_7, window_bounds = array<i64: 16, 128>}]} {
    %c0 = arith.constant 0 : index
    %c0_0 = arith.constant 0 : index
    %0 = vector.load %arg2[%c0, %c0_0] : memref<288x256xbf16, #tpu.memory_space<vmem>>, vector<288x256xbf16>
    %c0_1 = arith.constant 0 : index
    %c0_2 = arith.constant 0 : index
    %1 = vector.load %arg1[%c0_1, %c0_2] : memref<256x128xbf16, #tpu.memory_space<vmem>>, vector<256x128xbf16>
    %cst = arith.constant dense<0.000000e+00> : vector<288x128xf32>
    %2 = tpu.matmul %0, %1, %cst {dimension_numbers = #tpu.dot_dimension_numbers<[1], [0], [0], [1], [0, 0, 1, 1], [], []>} : vector<288x256xbf16>, vector<256x128xbf16>, vector<288x128xf32> -> vector<288x128xf32>
    %3 = vector.extract_strided_slice %2 {offsets = [0, 0], sizes = [144, 128], strides = [1, 1]} : vector<288x128xf32> to vector<144x128xf32>
    %4 = vector.extract_strided_slice %2 {offsets = [144, 0], sizes = [144, 128], strides = [1, 1]} : vector<288x128xf32> to vector<144x128xf32>
    %5 = arith.mulf %3, %3 : vector<144x128xf32>
    %6 = arith.mulf %4, %4 : vector<144x128xf32>
    %7 = arith.addf %5, %6 : vector<144x128xf32>
    %8 = math.sqrt %7 : vector<144x128xf32>
    %c0_3 = arith.constant 0 : index
    %c0_4 = arith.constant 0 : index
    %9 = vector.load %arg3[%c0_3, %c0_4] : memref<32x144xf32, #tpu.memory_space<vmem>>, vector<32x144xf32>
    %cst_5 = arith.constant dense<0.000000e+00> : vector<32x128xf32>
    %10 = tpu.matmul %9, %8, %cst_5 {dimension_numbers = #tpu.dot_dimension_numbers<[1], [0], [0], [1], [0, 0, 1, 1], [], []>} : vector<32x144xf32>, vector<144x128xf32>, vector<32x128xf32> -> vector<32x128xf32>
    %cst_6 = arith.constant 9.99999974E-6 : f32
    %11 = vector.broadcast %cst_6 : f32 to vector<32x128xf32>
    %12 = arith.maximumf %10, %11 : vector<32x128xf32>
    %13 = math.log %12 : vector<32x128xf32>
    %cst_7 = arith.constant 0.434294492 : f32
    %14 = vector.broadcast %cst_7 : f32 to vector<32x128xf32>
    %15 = arith.mulf %13, %14 : vector<32x128xf32>
    %cst_8 = arith.constant 2.000000e+01 : f32
    %16 = vector.broadcast %cst_8 : f32 to vector<32x128xf32>
    %17 = arith.mulf %16, %15 : vector<32x128xf32>
    %cst_9 = arith.constant -5.000000e+01 : f32
    %cst_10 = arith.constant 8.000000e+01 : f32
    %18 = vector.broadcast %cst_9 : f32 to vector<32x128xf32>
    %19 = arith.maximumf %18, %17 : vector<32x128xf32>
    %20 = vector.broadcast %cst_10 : f32 to vector<32x128xf32>
    %21 = arith.minimumf %20, %19 : vector<32x128xf32>
    %c0_11 = arith.constant 0 : index
    %c0_12 = arith.constant 0 : index
    %22 = vector.load %arg7[%c0_11, %c0_12] : memref<32x128xf32, #tpu.memory_space<vmem>>, vector<32x128xf32>
    tpu.vector_store %arg7[%c0_11, %c0_12], %21 {strides = array<i32>} : memref<32x128xf32, #tpu.memory_space<vmem>>, vector<32x128xf32>,
    %c0_13 = arith.constant 0 : index
    %c0_14 = arith.constant 0 : index
    %23 = vector.load %arg5[%c0_13, %c0_14] : memref<160x128xbf16, #tpu.memory_space<vmem>>, vector<160x128xbf16>
    %c0_15 = arith.constant 0 : index
    %c0_16 = arith.constant 0 : index
    %24 = vector.load %arg4[%c0_15, %c0_16] : memref<128x128xbf16, #tpu.memory_space<vmem>>, vector<128x128xbf16>
    %cst_17 = arith.constant dense<0.000000e+00> : vector<160x128xf32>
    %25 = tpu.matmul %23, %24, %cst_17 {dimension_numbers = #tpu.dot_dimension_numbers<[1], [0], [0], [1], [0, 0, 1, 1], [], []>} : vector<160x128xbf16>, vector<128x128xbf16>, vector<160x128xf32> -> vector<160x128xf32>
    %26 = vector.extract_strided_slice %25 {offsets = [0, 0], sizes = [80, 128], strides = [1, 1]} : vector<160x128xf32> to vector<80x128xf32>
    %27 = vector.extract_strided_slice %25 {offsets = [80, 0], sizes = [80, 128], strides = [1, 1]} : vector<160x128xf32> to vector<80x128xf32>
    %28 = arith.mulf %26, %26 : vector<80x128xf32>
    %29 = arith.mulf %27, %27 : vector<80x128xf32>
    %30 = arith.addf %28, %29 : vector<80x128xf32>
    %c0_18 = arith.constant 0 : index
    %c0_19 = arith.constant 0 : index
    %31 = vector.load %arg6[%c0_18, %c0_19] : memref<16x80xf32, #tpu.memory_space<vmem>>, vector<16x80xf32>
    %cst_20 = arith.constant dense<0.000000e+00> : vector<16x128xf32>
    %32 = tpu.matmul %31, %30, %cst_20 {dimension_numbers = #tpu.dot_dimension_numbers<[1], [0], [0], [1], [0, 0, 1, 1], [], []>} : vector<16x80xf32>, vector<80x128xf32>, vector<16x128xf32> -> vector<16x128xf32>
    %cst_21 = arith.constant 1.000000e-10 : f32
    %33 = vector.broadcast %cst_21 : f32 to vector<16x128xf32>
    %34 = arith.maximumf %32, %33 : vector<16x128xf32>
    %35 = math.log %34 : vector<16x128xf32>
    %cst_22 = arith.constant 0.434294492 : f32
    %36 = vector.broadcast %cst_22 : f32 to vector<16x128xf32>
    %37 = arith.mulf %35, %36 : vector<16x128xf32>
    %cst_23 = arith.constant 1.000000e+01 : f32
    %38 = vector.broadcast %cst_23 : f32 to vector<16x128xf32>
    %39 = arith.mulf %38, %37 : vector<16x128xf32>
    %c0_24 = arith.constant 0 : index
    %c0_25 = arith.constant 0 : index
    %40 = vector.load %arg8[%c0_24, %c0_25] : memref<16x128xf32, #tpu.memory_space<vmem>>, vector<16x128xf32>
    tpu.vector_store %arg8[%c0_24, %c0_25], %39 {strides = array<i32>} : memref<16x128xf32, #tpu.memory_space<vmem>>, vector<16x128xf32>,
    return
  }
  func.func @transform_0(%arg0: i32) -> (i32, i32) {
    %c0_i32 = arith.constant 0 : i32
    %c0_i32_0 = arith.constant 0 : i32
    return %c0_i32, %arg0 : i32, i32
  }
  func.func @transform_1(%arg0: i32) -> (i32, i32) {
    %c0_i32 = arith.constant 0 : i32
    %c0_i32_0 = arith.constant 0 : i32
    %c0_i32_1 = arith.constant 0 : i32
    return %c0_i32, %c0_i32_0 : i32, i32
  }
  func.func @transform_2(%arg0: i32) -> (i32, i32) {
    %c0_i32 = arith.constant 0 : i32
    %c0_i32_0 = arith.constant 0 : i32
    %c0_i32_1 = arith.constant 0 : i32
    return %c0_i32, %c0_i32_0 : i32, i32
  }
  func.func @transform_3(%arg0: i32) -> (i32, i32) {
    %c0_i32 = arith.constant 0 : i32
    %c0_i32_0 = arith.constant 0 : i32
    return %c0_i32, %arg0 : i32, i32
  }
  func.func @transform_4(%arg0: i32) -> (i32, i32) {
    %c0_i32 = arith.constant 0 : i32
    %c0_i32_0 = arith.constant 0 : i32
    %c0_i32_1 = arith.constant 0 : i32
    return %c0_i32, %c0_i32_0 : i32, i32
  }
  func.func @transform_5(%arg0: i32) -> (i32, i32) {
    %c0_i32 = arith.constant 0 : i32
    %c0_i32_0 = arith.constant 0 : i32
    %c0_i32_1 = arith.constant 0 : i32
    return %c0_i32, %c0_i32_0 : i32, i32
  }
  func.func @transform_6(%arg0: i32) -> (i32, i32) {
    %c0_i32 = arith.constant 0 : i32
    %c0_i32_0 = arith.constant 0 : i32
    return %c0_i32, %arg0 : i32, i32
  }
  func.func @transform_7(%arg0: i32) -> (i32, i32) {
    %c0_i32 = arith.constant 0 : i32
    %c0_i32_0 = arith.constant 0 : i32
    return %c0_i32, %arg0 : i32, i32
  }
}

</mosaic_0001>

<bundles_post_ra>
// kernel: tpu_custom_call.1
= control target key start
LH: loop header
LB: loop body
LE: loop exit
PB: predicated region body
PF: predicated region fallthrough
CT: control target
= control target key end

     0   :  { %13 = vsyncpa [#allocation3], 0  ;;  %s2146_s0 = inlined_call_operand.hbm [shape: bf16[256,128], index: 0, kind: input, shape index: {}]   ;;  %s2147_s1 = inlined_call_operand.hbm [shape: bf16[288,256], index: 1, kind: input, shape index: {}]   ;;  %s2148_s2 = inlined_call_operand.hbm [shape: f32[32,144], index: 2, kind: input, shape index: {}]   ;;  %s2149_s3 = inlined_call_operand.hbm [shape: bf16[128,128], index: 3, kind: input, shape index: {}]   ;;  %s2150_s4 = inlined_call_operand.hbm [shape: bf16[160,128], index: 4, kind: input, shape index: {}]   ;;  %s2151_s5 = inlined_call_operand.vmem [shape: f32[16,80], index: 5, kind: input, shape index: {}]   ;;  %s2152_s6 = inlined_call_operand.hbm [shape: f32[32,128], index: 6, kind: output, shape index: {0}]   ;;  %s2153_s7 = inlined_call_operand.hbm [shape: f32[16,128], index: 7, kind: output, shape index: {1}]  }
   0x1   :  { %14 = vsyncpa [#allocation6], 0 }
   0x2   :  { %15 = vsyncpa [#allocation9], 0 }
   0x3   :  { %16 = vsyncpa [#allocation4], 0 }
   0x4   :  { %17 = vsyncpa [#allocation13], 0  ;;  %s1880_s24 = smov [#allocation5]   ;;  %s1716_s28 = scalar_lea.hbm %s2147_s1, 4608 }
   0x5   :  { %s35_s25 = sshll.u32 %s1880_s24, 4  ;;  %p1717_p0 = scmp.ne.s32.totalorder %s2147_s1, %s1716_s28  ;;  %s36_s25 = int_to_ptr.vmem [resolvable:$true] %s35_s25 }
   0x6   :  { %p1720_p1 = scmp.lt.u32.totalorder %s1716_s28, %s2147_s1 }
   0x8   :  { %p1722_p2 = pnand %p1720_p1, %p1717_p0 }
   0xa   :  { %1725 = shalt.err (!%p1722_p2)
}
   0xb   :  { %s1726_s10 = scalar_lea.vmem %s36_s25, 4608  ;;  %p1731_p4 = scmp.lt.s32.totalorder %s36_s25, %s36_s25 }
   0xc   :  { %p1727_p3 = scmp.ne.s32.totalorder %s36_s25, %s1726_s10  ;;  %p1732_p5 = scmp.lt.s32.totalorder %s1726_s10, %s1726_s10 }
   0xe   :  { %p1733_p6 = por %p1732_p5, %p1731_p4 }
  0x10   :  { %p1734_p7 = pnand %p1733_p6, %p1727_p3 }
  0x12   :  { %1737 = shalt.err (!%p1734_p7)
}
  0x13   :  { %s1881_s11 = smov 128   ;;  %s1882_s12 = smov 8  }
  0x14   :  { %41 = dma.hbm_to_vmem [thread:$0]  %s2147_s1, 4608, %s36_s25, [#allocation6], %s1881_s11, %s1881_s11, %s1882_s12  }
  0x15   :  { %s1883_s15 = smov [#allocation8]   ;;  %s1884_s17 = smov [#allocation2]  }
  0x16   :  { %s59_s16 = sshll.u32 %s1883_s15, 4  ;;  %s23_s18 = sshll.u32 %s1884_s17, 4  ;;  %s60_s16 = int_to_ptr.vmem [resolvable:$true] %s59_s16  ;;  %s24_s18 = int_to_ptr.vmem [resolvable:$true] %s23_s18 }
  0x17   :  { %s1738_s21 = scalar_lea.hbm %s2149_s3, 1024 }
  0x18   :  { %p1739_p8 = scmp.ne.s32.totalorder %s2149_s3, %s1738_s21  ;;  %p1742_p9 = scmp.lt.u32.totalorder %s1738_s21, %s2149_s3 }
  0x1a   :  { %p1744_p10 = pnand %p1742_p9, %p1739_p8 }
  0x1c   :  { %1747 = shalt.err (!%p1744_p10)
}
  0x1d   :  { %s1748_s1 = scalar_lea.vmem %s60_s16, 1024  ;;  %p1753_p12 = scmp.lt.s32.totalorder %s60_s16, %s60_s16 }
  0x1e   :  { %p1749_p11 = scmp.ne.s32.totalorder %s60_s16, %s1748_s1  ;;  %p1754_p13 = scmp.lt.s32.totalorder %s1748_s1, %s1748_s1 }
  0x20   :  { %p1755_p0 = por %p1754_p13, %p1753_p12 }
  0x22   :  { %p1756_p1 = pnand %p1755_p0, %p1749_p11 }
  0x24   :  { %1759 = shalt.err (!%p1756_p1)
}
  0x25   :  { %s1885_s25 = smov 64   ;;  %s1886_s27 = smov 4  }
  0x26   :  { %65 = dma.hbm_to_vmem [thread:$0]  %s2149_s3, 1024, %s60_s16, [#allocation9], %s1885_s25, %s1885_s25, %s1886_s27  }
  0x27   :  { %s1760_s9 = scalar_lea.hbm %s2146_s0, 2048 }
  0x28   :  { %p1761_p2 = scmp.ne.s32.totalorder %s2146_s0, %s1760_s9  ;;  %p1764_p3 = scmp.lt.u32.totalorder %s1760_s9, %s2146_s0 }
  0x2a   :  { %p1766_p4 = pnand %p1764_p3, %p1761_p2 }
  0x2c   :  { %1769 = shalt.err (!%p1766_p4)
}
  0x2d   :  { %s1770_s17 = scalar_lea.vmem %s24_s18, 2048  ;;  %p1775_p6 = scmp.lt.s32.totalorder %s24_s18, %s24_s18 }
  0x2e   :  { %p1771_p5 = scmp.ne.s32.totalorder %s24_s18, %s1770_s17  ;;  %p1776_p7 = scmp.lt.s32.totalorder %s1770_s17, %s1770_s17 }
  0x30   :  { %p1777_p8 = por %p1776_p7, %p1775_p6 }
  0x32   :  { %p1778_p9 = pnand %p1777_p8, %p1771_p5 }
  0x34   :  { %1781 = shalt.err (!%p1778_p9)
}
  0x35   :  { %29 = dma.hbm_to_vmem [thread:$0]  %s2146_s0, 2048, %s24_s18, [#allocation3], %s1885_s25, %s1885_s25, %s1886_s27  }
  0x36   :  { %s1887_s19 = smov [#allocation7]   ;;  %s1782_s23 = scalar_lea.hbm %s2148_s2, 1024 }
  0x37   :  { %s47_s20 = sshll.u32 %s1887_s19, 4  ;;  %p1783_p10 = scmp.ne.s32.totalorder %s2148_s2, %s1782_s23  ;;  %s48_s20 = int_to_ptr.vmem [resolvable:$true] %s47_s20 }
  0x38   :  { %p1786_p11 = scmp.lt.u32.totalorder %s1782_s23, %s2148_s2 }
  0x3a   :  { %p1788_p12 = pnand %p1786_p11, %p1783_p10 }
  0x3c   :  { %1791 = shalt.err (!%p1788_p12)
}
  0x3d   :  { %s1792_s29 = scalar_lea.vmem %s48_s20, 1024  ;;  %p1797_p0 = scmp.lt.s32.totalorder %s48_s20, %s48_s20 }
  0x3e   :  { %p1793_p13 = scmp.ne.s32.totalorder %s48_s20, %s1792_s29  ;;  %p1798_p1 = scmp.lt.s32.totalorder %s1792_s29, %s1792_s29 }
  0x40   :  { %p1799_p2 = por %p1798_p1, %p1797_p0 }
  0x42   :  { %p1800_p3 = pnand %p1799_p2, %p1793_p13 }
  0x44   :  { %1803 = shalt.err (!%p1800_p3)
}
  0x45   :  { %s1888_s0 = smov 256   ;;  %s1889_s18 = smov 16  }
  0x46   :  { %53 = dma.hbm_to_vmem [thread:$0]  %s2148_s2, 1024, %s48_s20, [#allocation6], %s1888_s0, %s1888_s0, %s1889_s18  }
  0x47   :  { %s1890_s9 = smov [#allocation10]   ;;  %s1804_s15 = scalar_lea.hbm %s2150_s4, 1280 }
  0x48   :  { %s71_s10 = sshll.u32 %s1890_s9, 4  ;;  %p1805_p4 = scmp.ne.s32.totalorder %s2150_s4, %s1804_s15  ;;  %s72_s10 = int_to_ptr.vmem [resolvable:$true] %s71_s10 }
  0x49   :  { %p1808_p5 = scmp.lt.u32.totalorder %s1804_s15, %s2150_s4 }
  0x4b   :  { %p1810_p6 = pnand %p1808_p5, %p1805_p4 }
  0x4d   :  { %1813 = shalt.err (!%p1810_p6)
}
  0x4e   :  { %s1814_s21 = scalar_lea.vmem %s72_s10, 1280  ;;  %p1819_p8 = scmp.lt.s32.totalorder %s72_s10, %s72_s10 }
  0x4f   :  { %p1815_p7 = scmp.ne.s32.totalorder %s72_s10, %s1814_s21  ;;  %p1820_p9 = scmp.lt.s32.totalorder %s1814_s21, %s1814_s21 }
  0x51   :  { %p1821_p10 = por %p1820_p9, %p1819_p8 }
  0x53   :  { %p1822_p11 = pnand %p1821_p10, %p1815_p7 }
  0x55   :  { %1825 = shalt.err (!%p1822_p11)
}
  0x56   :  { %77 = dma.hbm_to_vmem [thread:$0]  %s2150_s4, 1280, %s72_s10, [#allocation9], %s1885_s25, %s1885_s25, %s1886_s27  }
  0x57   :  { %1870 = dma.done.wait [#allocation3], 2048  }
  0x58   :  { %1871 = vsyncadd [#allocation3], 4294965248 }
  0x59   :  { %1872 = dma.done.wait [#allocation6], 5632  }
  0x5a   :  { %1873 = vsyncadd [#allocation6], 4294961664 }
  0x5b   :  { %1874 = dma.done.wait [#allocation9], 2304  }
  0x5c   :  { %1875 = vsyncadd [#allocation9], 4294964992  ;;  %v1891_v0 = vmov 0   ;;  %v1580_v1 = vld [vmem:[#allocation2] sm:$0xff]   ;;  %v1581_v2 = vld [vmem:[#allocation2 + $0x8] sm:$0xff]   ;;  %v1892_v53 = vmov 0.0|0.0  }
  0x5d   :  { %440 = vmatprep.subr.bf16.mxu0 %v1891_v0  ;;  %v1582_v3 = vld [vmem:[#allocation2 + $0x10] sm:$0xff]   ;;  %v1583_v4 = vld [vmem:[#allocation2 + $0x18] sm:$0xff]   ;;  %v1584_v5 = vld [vmem:[#allocation2 + $0x20] sm:$0xff]   ;;  %1518 = vmatprep.subr.bf16.mxu1 %v1892_v53  ;;  %vm805_vm0 = vcmask 130048   ;;  %s1893_s23 = smov [#allocation11]  }
  0x5e   :  { %441 = vmatpush1.bf16.msra.mxu0 %v1580_v1  ;;  %v1598_v6 = vld [vmem:[#allocation5 + $0x4] ss:$8 sps:$4 sm:$0xff]   ;;  %v1586_v8 = vld [vmem:[#allocation2 + $0x30] sm:$0xff]   ;;  %v1587_v9 = vld [vmem:[#allocation2 + $0x38] sm:$0xff]   ;;  %s1323_s24 = sshll.u32 %s1893_s23, 4  ;;  %s1324_s24 = int_to_ptr.vmem [resolvable:$true] %s1323_s24 }
  0x5f   :  { %442 = vmatprep.subr.bf16.mxu0 %v1891_v0  ;;  %v1585_v7 = vld [vmem:[#allocation2 + $0x28] sm:$0xff]   ;;  %472 = vmatprep.mubr.bf16.mxu0 %v1598_v6  ;;  %v1588_v10 = vld [vmem:[#allocation2 + $0x40] sm:$0xff]   ;;  %v1590_v12 = vld [vmem:[#allocation2 + $0x50] sm:$0xff]   ;;  %s1826_s26 = scalar_lea.vmem %s1324_s24, 512  ;;  %p1831_p13 = scmp.lt.s32.totalorder %s1324_s24, %s1324_s24 }
  0x60   :  { %v1589_v11 = vld [vmem:[#allocation2 + $0x48] sm:$0xff]   ;;  %v1591_v13 = vld [vmem:[#allocation2 + $0x58] sm:$0xff]   ;;  %v1592_v14 = vld [vmem:[#allocation2 + $0x60] sm:$0xff]   ;;  %p1827_p12 = scmp.ne.s32.totalorder %s1324_s24, %s1826_s26  ;;  %p1832_p0 = scmp.lt.s32.totalorder %s1826_s26, %s1826_s26 }
  0x61   :  { %v1593_v15 = vld [vmem:[#allocation2 + $0x68] sm:$0xff]   ;;  %v1594_v16 = vld [vmem:[#allocation2 + $0x70] sm:$0xff]   ;;  %v1595_v17 = vld [vmem:[#allocation2 + $0x78] sm:$0xff]  }
  0x62   :  { %443 = vmatpush1.bf16.msra.mxu0 %v1581_v2  ;;  %v1596_v18 = vld [vmem:[#allocation5] ss:$8 sps:$4 sm:$0xff]   ;;  %v1599_v19 = vld [vmem:[#allocation5 + $0x14] ss:$8 sps:$4 sm:$0xff]   ;;  %v1601_v20 = vld [vmem:[#allocation5 + $0x10] ss:$8 sps:$4 sm:$0xff]   ;;  %p1833_p1 = por %p1832_p0, %p1831_p13 }
  0x63   :  { %444 = vmatprep.subr.bf16.mxu0 %v1891_v0  ;;  %v1602_v21 = vld [vmem:[#allocation5 + $0x24] ss:$8 sps:$4 sm:$0xff]   ;;  %v1604_v22 = vld [vmem:[#allocation5 + $0x20] ss:$8 sps:$4 sm:$0xff]   ;;  %v1605_v23 = vld [vmem:[#allocation5 + $0x34] ss:$8 sps:$4 sm:$0xff]  }
  0x64   :  { %v1607_v24 = vld [vmem:[#allocation5 + $0x30] ss:$8 sps:$4 sm:$0xff]   ;;  %v1608_v25 = vld [vmem:[#allocation5 + $0x44] ss:$8 sps:$4 sm:$0xff]   ;;  %v1610_v26 = vld [vmem:[#allocation5 + $0x40] ss:$8 sps:$4 sm:$0xff]   ;;  %p1834_p2 = pnand %p1833_p1, %p1827_p12 }
  0x65   :  { %v1611_v27 = vld [vmem:[#allocation5 + $0x54] ss:$8 sps:$4 sm:$0xff]   ;;  %v1613_v28 = vld [vmem:[#allocation5 + $0x50] ss:$8 sps:$4 sm:$0xff]   ;;  %v1614_v29 = vld [vmem:[#allocation5 + $0x64] ss:$8 sps:$4 sm:$0xff]  }
  0x66   :  { %445 = vmatpush1.bf16.msra.mxu0 %v1582_v3  ;;  %v1616_v30 = vld [vmem:[#allocation5 + $0x60] ss:$8 sps:$4 sm:$0xff]   ;;  %v1617_v31 = vld [vmem:[#allocation5 + $0x74] ss:$8 sps:$4 sm:$0xff]   ;;  %v1619_v32 = vld [vmem:[#allocation5 + $0x70] ss:$8 sps:$4 sm:$0xff]  }
  0x67   :  { %446 = vmatprep.subr.bf16.mxu0 %v1891_v0  ;;  %v1620_v33 = vld [vmem:[#allocation5 + $0x84] ss:$8 sps:$4 sm:$0xff]   ;;  %v1622_v34 = vld [vmem:[#allocation5 + $0x80] ss:$8 sps:$4 sm:$0xff]   ;;  %v1623_v35 = vld [vmem:[#allocation5 + $0x94] ss:$8 sps:$4 sm:$0xff]  }
  0x68   :  { %v1625_v36 = vld [vmem:[#allocation5 + $0x90] ss:$8 sps:$4 sm:$0xff]   ;;  %v1626_v37 = vld [vmem:[#allocation5 + $0xa4] ss:$8 sps:$4 sm:$0xff]   ;;  %v1628_v38 = vld [vmem:[#allocation5 + $0xa0] ss:$8 sps:$4 sm:$0xff]  }
  0x69   :  { %v1629_v39 = vld [vmem:[#allocation5 + $0xb4] ss:$8 sps:$4 sm:$0xff]   ;;  %v1631_v40 = vld [vmem:[#allocation5 + $0xb0] ss:$8 sps:$4 sm:$0xff]   ;;  %v1632_v41 = vld [vmem:[#allocation5 + $0xc4] ss:$8 sps:$4 sm:$0xff]  }
  0x6a   :  { %447 = vmatpush1.bf16.msra.mxu0 %v1583_v4  ;;  %v1634_v42 = vld [vmem:[#allocation5 + $0xc0] ss:$8 sps:$4 sm:$0xff]   ;;  %v1635_v43 = vld [vmem:[#allocation5 + $0xd4] ss:$8 sps:$4 sm:$0xff]   ;;  %v1637_v44 = vld [vmem:[#allocation5 + $0xd0] ss:$8 sps:$4 sm:$0xff]  }
  0x6b   :  { %448 = vmatprep.subr.bf16.mxu0 %v1891_v0  ;;  %v1638_v45 = vld [vmem:[#allocation5 + $0xe4] ss:$8 sps:$4 sm:$0xff]   ;;  %v1640_v46 = vld [vmem:[#allocation5 + $0xe0] ss:$8 sps:$4 sm:$0xff]   ;;  %v1641_v47 = vld [vmem:[#allocation5 + $0xf4] ss:$8 sps:$4 sm:$0xff]  }
  0x6c   :  { %v1643_v48 = vld [vmem:[#allocation5 + $0xf0] ss:$8 sps:$4 sm:$0xff]   ;;  %v1644_v49 = vld [vmem:[#allocation5 + $0x104] ss:$8 sps:$4 sm:$0xff]   ;;  %v1646_v50 = vld [vmem:[#allocation5 + $0x100] ss:$8 sps:$4 sm:$0xff]  }
  0x6d   :  { %v1647_v51 = vld [vmem:[#allocation5 + $0x114] ss:$8 sps:$4 sm:$0xff]   ;;  %v1649_v52 = vld [vmem:[#allocation5 + $0x110] ss:$8 sps:$4 sm:$0xff]  }
  0x6e   :  { %449 = vmatpush1.bf16.msra.mxu0 %v1584_v5 }
  0x6f   :  { %450 = vmatprep.subr.bf16.mxu0 %v1891_v0 }
  0x72   :  { %451 = vmatpush1.bf16.msra.mxu0 %v1585_v7  ;;  %v798_v7 = vld [vmem:[#allocation7 + $0x8] sm:$0xff] }
  0x73   :  { %452 = vmatprep.subr.bf16.mxu0 %v1891_v0  ;;  %1405 = vmatprep.mubr.msk.f32.mxu1 %vm805_vm0, %v798_v7 }
  0x76   :  { %453 = vmatpush1.bf16.msra.mxu0 %v1586_v8 }
  0x77   :  { %454 = vmatprep.subr.bf16.mxu0 %v1891_v0 }
  0x7a   :  { %455 = vmatpush1.bf16.msra.mxu0 %v1587_v9 }
  0x7b   :  { %456 = vmatprep.subr.bf16.mxu0 %v1891_v0 }
  0x7e   :  { %457 = vmatpush1.bf16.msra.mxu0 %v1588_v10 }
  0x7f   :  { %458 = vmatprep.subr.bf16.mxu0 %v1891_v0 }
  0x82   :  { %459 = vmatpush1.bf16.msra.mxu0 %v1589_v11 }
  0x83   :  { %460 = vmatprep.subr.bf16.mxu0 %v1891_v0 }
  0x86   :  { %461 = vmatpush1.bf16.msra.mxu0 %v1590_v12 }
  0x87   :  { %462 = vmatprep.subr.bf16.mxu0 %v1891_v0 }
  0x8a   :  { %463 = vmatpush1.bf16.msra.mxu0 %v1591_v13 }
  0x8b   :  { %464 = vmatprep.subr.bf16.mxu0 %v1891_v0 }
  0x8e   :  { %465 = vmatpush1.bf16.msra.mxu0 %v1592_v14 }
  0x8f   :  { %466 = vmatprep.subr.bf16.mxu0 %v1891_v0 }
  0x92   :  { %467 = vmatpush1.bf16.msra.mxu0 %v1593_v15 }
  0x93   :  { %468 = vmatprep.subr.bf16.mxu0 %v1891_v0 }
  0x96   :  { %469 = vmatpush1.bf16.msra.mxu0 %v1594_v16 }
  0x97   :  { %470 = vmatprep.subr.bf16.mxu0 %v1891_v0 }
  0x9a   :  { %471 = vmatpush1.bf16.msra.mxu0 %v1595_v17 }
  0x9d   :  { %473 = vmatmul.mubr.bf16.vlgmr.msra.gmra.mrb[0].mxu0 %v1596_v18 }
  0x9e   :  { %480 = vmatprep.mubr.bf16.mxu0 %v1599_v19 }
  0xa5   :  { %481 = vmatmul.mubr.bf16.gmra.mrb[4].mxu0 %v1601_v20 }
  0xa6   :  { %488 = vmatprep.mubr.bf16.mxu0 %v1602_v21 }
  0xad   :  { %489 = vmatmul.mubr.bf16.gmra.mrb[8].mxu0 %v1604_v22 }
  0xae   :  { %496 = vmatprep.mubr.bf16.mxu0 %v1605_v23 }
  0xb5   :  { %497 = vmatmul.mubr.bf16.gmra.mrb[12].mxu0 %v1607_v24 }
  0xb6   :  { %504 = vmatprep.mubr.bf16.mxu0 %v1608_v25 }
  0xbd   :  { %505 = vmatmul.mubr.bf16.gmra.mrb[16].mxu0 %v1610_v26 }
  0xbe   :  { %512 = vmatprep.mubr.bf16.mxu0 %v1611_v27 }
  0xc5   :  { %513 = vmatmul.mubr.bf16.gmra.mrb[20].mxu0 %v1613_v28 }
  0xc6   :  { %520 = vmatprep.mubr.bf16.mxu0 %v1614_v29 }
  0xcd   :  { %521 = vmatmul.mubr.bf16.gmra.mrb[24].mxu0 %v1616_v30 }
  0xce   :  { %528 = vmatprep.mubr.bf16.mxu0 %v1617_v31 }
  0xd5   :  { %529 = vmatmul.mubr.bf16.gmra.mrb[28].mxu0 %v1619_v32 }
  0xd6   :  { %536 = vmatprep.mubr.bf16.mxu0 %v1620_v33 }
  0xdd   :  { %537 = vmatmul.mubr.bf16.gmra.mrb[32].mxu0 %v1622_v34 }
  0xde   :  { %544 = vmatprep.mubr.bf16.mxu0 %v1623_v35 }
  0xe5   :  { %545 = vmatmul.mubr.bf16.gmra.mrb[36].mxu0 %v1625_v36 }
  0xe6   :  { %552 = vmatprep.mubr.bf16.mxu0 %v1626_v37 }
  0xed   :  { %553 = vmatmul.mubr.bf16.gmra.mrb[40].mxu0 %v1628_v38 }
  0xee   :  { %560 = vmatprep.mubr.bf16.mxu0 %v1629_v39 }
  0xf5   :  { %561 = vmatmul.mubr.bf16.gmra.mrb[44].mxu0 %v1631_v40 }
  0xf6   :  { %568 = vmatprep.mubr.bf16.mxu0 %v1632_v41 }
  0xfd   :  { %569 = vmatmul.mubr.bf16.gmra.mrb[48].mxu0 %v1634_v42 }
  0xfe   :  { %576 = vmatprep.mubr.bf16.mxu0 %v1635_v43 }
 0x105   :  { %577 = vmatmul.mubr.bf16.gmra.mrb[52].mxu0 %v1637_v44 }
 0x106   :  { %584 = vmatprep.mubr.bf16.mxu0 %v1638_v45 }
 0x10d   :  { %585 = vmatmul.mubr.bf16.gmra.mrb[56].mxu0 %v1640_v46 }
 0x10e   :  { %592 = vmatprep.mubr.bf16.mxu0 %v1641_v47 }
 0x115   :  { %593 = vmatmul.mubr.bf16.gmra.mrb[60].mxu0 %v1643_v48 }
 0x116   :  { %600 = vmatprep.mubr.bf16.mxu0 %v1644_v49 }
 0x11d   :  { %601 = vmatmul.mubr.bf16.gmra.mrb[64].mxu0 %v1646_v50 }
 0x11e   :  { %608 = vmatprep.mubr.bf16.mxu0 %v1647_v51 }
 0x125   :  { %609 = vmatmul.mubr.bf16.gmra.mrb[68].mxu0 %v1649_v52 }
 0x170   :  { %v474_v54 = vpop.f32.mrb[0].mxu0 }
 0x171   :  { %v476_v55 = vpop.f32.mrb[1].mxu0  ;;  %v617_v28 = vmul.f32 %v474_v54, %v474_v54 }
 0x172   :  { %v477_v56 = vpop.f32.mrb[2].mxu0 }
 0x173   :  { %v479_v57 = vpop.f32.mrb[3].mxu0  ;;  %v618_v32 = vmul.f32 %v477_v56, %v477_v56 }
 0x178   :  { %v482_v58 = vpop.f32.mrb[4].mxu0 }
 0x179   :  { %v484_v59 = vpop.f32.mrb[5].mxu0  ;;  %v619_v38 = vmul.f32 %v482_v58, %v482_v58 }
 0x17a   :  { %v485_v60 = vpop.f32.mrb[6].mxu0 }
 0x17b   :  { %v487_v61 = vpop.f32.mrb[7].mxu0  ;;  %v620_v42 = vmul.f32 %v485_v60, %v485_v60 }
 0x180   :  { %v490_v62 = vpop.f32.mrb[8].mxu0 }
 0x181   :  { %v492_v63 = vpop.f32.mrb[9].mxu0  ;;  %v621_v51 = vmul.f32 %v490_v62, %v490_v62 }
 0x182   :  { %v493_v0 = vpop.f32.mrb[10].mxu0 }
 0x183   :  { %v495_v1 = vpop.f32.mrb[11].mxu0  ;;  %v622_v55 = vmul.f32 %v493_v0, %v493_v0 }
 0x188   :  { %v2008_v2 = vpop.f32.mrb[12].mxu0 }
 0x189   :  { %v500_v3 = vpop.f32.mrb[13].mxu0 }
 0x18a   :  { %v2010_v4 = vpop.f32.mrb[14].mxu0 }
 0x18b   :  { %v503_v5 = vpop.f32.mrb[15].mxu0 }
 0x190   :  { %v2012_v6 = vpop.f32.mrb[16].mxu0 }
 0x191   :  { %v508_v8 = vpop.f32.mrb[17].mxu0 }
 0x192   :  { %v2015_v9 = vpop.f32.mrb[18].mxu0 }
 0x193   :  { %v511_v10 = vpop.f32.mrb[19].mxu0 }
 0x198   :  { %v2017_v11 = vpop.f32.mrb[20].mxu0 }
 0x199   :  { %v516_v12 = vpop.f32.mrb[21].mxu0 }
 0x19a   :  { %v2019_v13 = vpop.f32.mrb[22].mxu0 }
 0x19b   :  { %v519_v14 = vpop.f32.mrb[23].mxu0 }
 0x1a0   :  { %v2021_v15 = vpop.f32.mrb[24].mxu0 }
 0x1a1   :  { %v524_v16 = vpop.f32.mrb[25].mxu0 }
 0x1a2   :  { %v2023_v17 = vpop.f32.mrb[26].mxu0  ;;  %v623_v16 = vmul.f32 %v2008_v2, %v2008_v2 }
 0x1a3   :  { %v527_v18 = vpop.f32.mrb[27].mxu0 }
 0x1a8   :  { %v2025_v19 = vpop.f32.mrb[28].mxu0 }
 0x1a9   :  { %v532_v20 = vpop.f32.mrb[29].mxu0 }
 0x1aa   :  { %v2027_v21 = vpop.f32.mrb[30].mxu0 }
 0x1ab   :  { %v535_v22 = vpop.f32.mrb[31].mxu0 }
 0x1ac   :  { %v624_v22 = vmul.f32 %v2010_v4, %v2010_v4 }
 0x1b0   :  { %v2029_v23 = vpop.f32.mrb[32].mxu0 }
 0x1b1   :  { %v540_v24 = vpop.f32.mrb[33].mxu0 }
 0x1b2   :  { %v2031_v25 = vpop.f32.mrb[34].mxu0 }
 0x1b3   :  { %v543_v26 = vpop.f32.mrb[35].mxu0 }
 0x1b8   :  { %v546_v27 = vpop.f32.mrb[36].mxu0 }
 0x1b9   :  { %v635_v29 = vmul.f32 %v546_v27, %v546_v27  ;;  %v548_v30 = vpop.f32.mrb[37].mxu0 }
 0x1ba   :  { %v549_v31 = vpop.f32.mrb[38].mxu0 }
 0x1bb   :  { %v653_v33 = vadd.f32 %v635_v29, %v617_v28  ;;  %v636_v34 = vmul.f32 %v549_v31, %v549_v31  ;;  %v551_v35 = vpop.f32.mrb[39].mxu0 }
 0x1bd   :  { %v654_v36 = vadd.f32 %v636_v34, %v618_v32  ;;  %1668 = vrsqrt.f32 %v653_v33  ;;  %vm673_vm1 = vcmp.eq.f32.partialorder %v653_v33, inf  ;;  %v676_v58 = vand.u32 2147483648, %v653_v33 }
 0x1be   :  { %vm675_vm3 = vcmp.eq.f32.partialorder %v653_v33, 0.0 }
 0x1bf   :  { %1670 = vrsqrt.f32 %v654_v36  ;;  %vm680_vm2 = vcmp.eq.f32.partialorder %v654_v36, inf  ;;  %v683_v1 = vand.u32 2147483648, %v654_v36  ;;  %vm682_vm4 = vcmp.eq.f32.partialorder %v654_v36, 0.0 }
 0x1c0   :  { %v554_v37 = vpop.f32.mrb[40].mxu0 }
 0x1c1   :  { %v637_v39 = vmul.f32 %v554_v37, %v554_v37  ;;  %v556_v40 = vpop.f32.mrb[41].mxu0 }
 0x1c2   :  { %v557_v41 = vpop.f32.mrb[42].mxu0  ;;  %v625_v40 = vmul.f32 %v2012_v6, %v2012_v6 }
 0x1c3   :  { %v655_v43 = vadd.f32 %v637_v39, %v619_v38  ;;  %v638_v44 = vmul.f32 %v557_v41, %v557_v41  ;;  %v559_v45 = vpop.f32.mrb[43].mxu0 }
 0x1c5   :  { %1672 = vrsqrt.f32 %v655_v43  ;;  %v656_v46 = vadd.f32 %v638_v44, %v620_v42  ;;  %vm687_vm5 = vcmp.eq.f32.partialorder %v655_v43, inf  ;;  %v690_v27 = vand.u32 2147483648, %v655_v43 }
 0x1c6   :  { %vm689_vm7 = vcmp.eq.f32.partialorder %v655_v43, 0.0 }
 0x1c7   :  { %v1669_v47 = vpop.eup %1668  ;;  %1674 = vrsqrt.f32 %v656_v46  ;;  %vm694_vm6 = vcmp.eq.f32.partialorder %v656_v46, inf  ;;  %v697_v32 = vand.u32 2147483648, %v656_v46  ;;  %vm696_vm8 = vcmp.eq.f32.partialorder %v656_v46, 0.0 }
 0x1c8   :  { %v562_v48 = vpop.f32.mrb[44].mxu0  ;;  %v672_v49 = vmul.f32 %v1669_v47, %v653_v33 }
 0x1c9   :  { %v1671_v50 = vpop.eup %1670  ;;  %v639_v52 = vmul.f32 %v562_v48, %v562_v48  ;;  %v564_v54 = vpop.f32.mrb[45].mxu0 }
 0x1ca   :  { %v565_v56 = vpop.f32.mrb[46].mxu0  ;;  %v674_v57 = vsel %vm673_vm1, %v653_v33, %v672_v49  ;;  %v679_v59 = vmul.f32 %v1671_v50, %v654_v36 }
 0x1cb   :  { %v2033_v60 = vadd.f32 %v639_v52, %v621_v51  ;;  %v640_v61 = vmul.f32 %v565_v56, %v565_v56  ;;  %v567_v63 = vpop.f32.mrb[47].mxu0  ;;  %v677_v5 = vsel %vm675_vm3, %v676_v58, %v674_v57 }
 0x1cc   :  { %v681_v3 = vsel %vm680_vm2, %v654_v36, %v679_v59 }
 0x1cd   :  { %1676 = vrsqrt.f32 %v2033_v60  ;;  %v658_v62 = vadd.f32 %v640_v61, %v622_v55  ;;  %v684_v7 = vsel %vm682_vm4, %v683_v1, %v681_v3  ;;  %vm701_vm9 = vcmp.eq.f32.partialorder %v2033_v60, inf }
 0x1ce   :  { %v1519_v8 = vpack.c.bf16 %v684_v7, %v677_v5  ;;  %vm703_vm11 = vcmp.eq.f32.partialorder %v2033_v60, 0.0  ;;  %v627_v61 = vmul.f32 %v2017_v11, %v2017_v11  ;;  %v628_v1 = vmul.f32 %v2019_v13, %v2019_v13 }
 0x1cf   :  { %v1673_v0 = vpop.eup %1672  ;;  %1678 = vrsqrt.f32 %v658_v62  ;;  %vm708_vm10 = vcmp.eq.f32.partialorder %v658_v62, inf  ;;  %v711_v6 = vand.u32 2147483648, %v658_v62  ;;  %vm710_vm12 = vcmp.eq.f32.partialorder %v658_v62, 0.0 }
 0x1d0   :  { %v570_v10 = vpop.f32.mrb[48].mxu0  ;;  %1520 = vmatpush1.bf16.msra.mxu1 %v1519_v8  ;;  %v686_v12 = vmul.f32 %v1673_v0, %v655_v43 }
 0x1d1   :  { %v1675_v14 = vpop.eup %1674  ;;  %v641_v18 = vmul.f32 %v570_v10, %v570_v10  ;;  %v572_v20 = vpop.f32.mrb[49].mxu0  ;;  %1521 = vmatprep.subr.bf16.mxu1 %v1892_v53 }
 0x1d2   :  { %v573_v24 = vpop.f32.mrb[50].mxu0  ;;  %v688_v26 = vsel %vm687_vm5, %v655_v43, %v686_v12  ;;  %v693_v28 = vmul.f32 %v1675_v14, %v656_v46  ;;  %v626_v43 = vmul.f32 %v2015_v9, %v2015_v9 }
 0x1d3   :  { %v2041_v29 = vadd.f32 %v641_v18, %v623_v16  ;;  %v642_v30 = vmul.f32 %v573_v24, %v573_v24  ;;  %v575_v31 = vpop.f32.mrb[51].mxu0  ;;  %v691_v34 = vsel %vm689_vm7, %v690_v27, %v688_v26  ;;  %v629_v27 = vmul.f32 %v2021_v15, %v2021_v15 }
 0x1d4   :  { %v695_v2 = vsel %vm694_vm6, %v656_v46, %v693_v28  ;;  %v704_v46 = vand.u32 2147483648, %v2033_v60 }
 0x1d5   :  { %1680 = vrsqrt.f32 %v2041_v29  ;;  %v660_v33 = vadd.f32 %v642_v30, %v624_v22  ;;  %v698_v35 = vsel %vm696_vm8, %v697_v32, %v695_v2  ;;  %vm715_vm13 = vcmp.eq.f32.partialorder %v2041_v29, inf }
 0x1d6   :  { %v1522_v36 = vpack.c.bf16 %v698_v35, %v691_v34  ;;  %v718_v5 = vand.u32 2147483648, %v2041_v29  ;;  %vm717_vm15 = vcmp.eq.f32.partialorder %v2041_v29, 0.0  ;;  %v630_v30 = vmul.f32 %v2023_v17, %v2023_v17 }
 0x1d7   :  { %v1677_v4 = vpop.eup %1676  ;;  %1682 = vrsqrt.f32 %v660_v33  ;;  %vm722_vm14 = vcmp.eq.f32.partialorder %v660_v33, inf  ;;  %v725_v11 = vand.u32 2147483648, %v660_v33  ;;  %vm724_vm1 = vcmp.eq.f32.partialorder %v660_v33, 0.0 }
 0x1d8   :  { %v578_v37 = vpop.f32.mrb[52].mxu0  ;;  %1523 = vmatpush1.bf16.msra.mxu1 %v1522_v36  ;;  %v700_v38 = vmul.f32 %v1677_v4, %v2033_v60 }
 0x1d9   :  { %v1679_v39 = vpop.eup %1678  ;;  %v643_v41 = vmul.f32 %v578_v37, %v578_v37  ;;  %v580_v42 = vpop.f32.mrb[53].mxu0  ;;  %1524 = vmatprep.subr.bf16.mxu1 %v1892_v53 }
 0x1da   :  { %v581_v44 = vpop.f32.mrb[54].mxu0  ;;  %v702_v45 = vsel %vm701_vm9, %v2033_v60, %v700_v38  ;;  %v707_v47 = vmul.f32 %v1679_v39, %v658_v62 }
 0x1db   :  { %v2053_v48 = vadd.f32 %v643_v41, %v625_v40  ;;  %v644_v49 = vmul.f32 %v581_v44, %v581_v44  ;;  %v583_v50 = vpop.f32.mrb[55].mxu0  ;;  %v705_v9 = vsel %vm703_vm11, %v704_v46, %v702_v45  ;;  %v631_v44 = vmul.f32 %v2025_v19, %v2025_v19 }
 0x1dc   :  { %v709_v51 = vsel %vm708_vm10, %v658_v62, %v707_v47  ;;  %v632_v47 = vmul.f32 %v2027_v21, %v2027_v21 }
 0x1dd   :  { %1684 = vrsqrt.f32 %v2053_v48  ;;  %v662_v52 = vadd.f32 %v644_v49, %v626_v43  ;;  %v712_v54 = vsel %vm710_vm12, %v711_v6, %v709_v51  ;;  %vm729_vm2 = vcmp.eq.f32.partialorder %v2053_v48, inf }
 0x1de   :  { %v1525_v55 = vpack.c.bf16 %v712_v54, %v705_v9  ;;  %v732_v2 = vand.u32 2147483648, %v2053_v48  ;;  %vm731_vm4 = vcmp.eq.f32.partialorder %v2053_v48, 0.0 }
 0x1df   :  { %v1681_v56 = vpop.eup %1680  ;;  %1686 = vrsqrt.f32 %v662_v52  ;;  %vm736_vm3 = vcmp.eq.f32.partialorder %v662_v52, inf  ;;  %v739_v15 = vand.u32 2147483648, %v662_v52  ;;  %vm738_vm5 = vcmp.eq.f32.partialorder %v662_v52, 0.0 }
 0x1e0   :  { %v586_v57 = vpop.f32.mrb[56].mxu0  ;;  %1526 = vmatpush1.bf16.msra.mxu1 %v1525_v55  ;;  %v714_v58 = vmul.f32 %v1681_v56, %v2041_v29 }
 0x1e1   :  { %v1683_v59 = vpop.eup %1682  ;;  %v645_v63 = vmul.f32 %v586_v57, %v586_v57  ;;  %v588_v60 = vpop.f32.mrb[57].mxu0  ;;  %1527 = vmatprep.subr.bf16.mxu1 %v1892_v53 }
 0x1e2   :  { %v589_v3 = vpop.f32.mrb[58].mxu0  ;;  %v716_v62 = vsel %vm715_vm13, %v2041_v29, %v714_v58  ;;  %v721_v7 = vmul.f32 %v1683_v59, %v660_v33  ;;  %v633_v60 = vmul.f32 %v2029_v23, %v2029_v23 }
 0x1e3   :  { %v2066_v8 = vadd.f32 %v645_v63, %v627_v61  ;;  %v646_v0 = vmul.f32 %v589_v3, %v589_v3  ;;  %v591_v10 = vpop.f32.mrb[59].mxu0  ;;  %v719_v13 = vsel %vm717_vm15, %v718_v5, %v716_v62  ;;  %v634_v62 = vmul.f32 %v2031_v25, %v2031_v25 }
 0x1e4   :  { %v723_v12 = vsel %vm722_vm14, %v660_v33, %v721_v7 }
 0x1e5   :  { %1688 = vrsqrt.f32 %v2066_v8  ;;  %v664_v14 = vadd.f32 %v646_v0, %v628_v1  ;;  %v726_v16 = vsel %vm724_vm1, %v725_v11, %v723_v12  ;;  %vm743_vm6 = vcmp.eq.f32.partialorder %v2066_v8, inf }
 0x1e6   :  { %v1528_v18 = vpack.c.bf16 %v726_v16, %v719_v13  ;;  %v746_v50 = vand.u32 2147483648, %v2066_v8  ;;  %vm745_vm8 = vcmp.eq.f32.partialorder %v2066_v8, 0.0 }
 0x1e7   :  { %v1685_v20 = vpop.eup %1684  ;;  %1690 = vrsqrt.f32 %v664_v14  ;;  %vm750_vm7 = vcmp.eq.f32.partialorder %v664_v14, inf  ;;  %v753_v19 = vand.u32 2147483648, %v664_v14  ;;  %vm752_vm9 = vcmp.eq.f32.partialorder %v664_v14, 0.0 }
 0x1e8   :  { %v594_v22 = vpop.f32.mrb[60].mxu0  ;;  %1529 = vmatpush1.bf16.msra.mxu1 %v1528_v18  ;;  %v728_v24 = vmul.f32 %v1685_v20, %v2053_v48 }
 0x1e9   :  { %v1687_v26 = vpop.eup %1686  ;;  %v647_v28 = vmul.f32 %v594_v22, %v594_v22  ;;  %v596_v29 = vpop.f32.mrb[61].mxu0  ;;  %1530 = vmatprep.subr.bf16.mxu1 %v1892_v53 }
 0x1ea   :  { %v597_v31 = vpop.f32.mrb[62].mxu0  ;;  %v730_v32 = vsel %vm729_vm2, %v2053_v48, %v728_v24  ;;  %v735_v33 = vmul.f32 %v1687_v26, %v662_v52 }
 0x1eb   :  { %v2079_v34 = vadd.f32 %v647_v28, %v629_v27  ;;  %v648_v35 = vmul.f32 %v597_v31, %v597_v31  ;;  %v599_v36 = vpop.f32.mrb[63].mxu0  ;;  %v733_v17 = vsel %vm731_vm4, %v732_v2, %v730_v32 }
 0x1ec   :  { %v737_v4 = vsel %vm736_vm3, %v662_v52, %v735_v33 }
 0x1ed   :  { %1692 = vrsqrt.f32 %v2079_v34  ;;  %v666_v37 = vadd.f32 %v648_v35, %v630_v30  ;;  %v740_v38 = vsel %vm738_vm5, %v739_v15, %v737_v4  ;;  %vm757_vm10 = vcmp.eq.f32.partialorder %v2079_v34, inf }
 0x1ee   :  { %v1531_v39 = vpack.c.bf16 %v740_v38, %v733_v17  ;;  %vm759_vm12 = vcmp.eq.f32.partialorder %v2079_v34, 0.0 }
 0x1ef   :  { %v1689_v40 = vpop.eup %1688  ;;  %1694 = vrsqrt.f32 %v666_v37  ;;  %vm764_vm11 = vcmp.eq.f32.partialorder %v666_v37, inf  ;;  %v767_v23 = vand.u32 2147483648, %v666_v37  ;;  %vm766_vm13 = vcmp.eq.f32.partialorder %v666_v37, 0.0 }
 0x1f0   :  { %v602_v41 = vpop.f32.mrb[64].mxu0  ;;  %1532 = vmatpush1.bf16.msra.mxu1 %v1531_v39  ;;  %v742_v42 = vmul.f32 %v1689_v40, %v2066_v8  ;;  %v1650_v40 = vld [vmem:[#allocation8] sm:$0xff]  }
 0x1f1   :  { %v1691_v43 = vpop.eup %1690  ;;  %v649_v45 = vmul.f32 %v602_v41, %v602_v41  ;;  %v604_v46 = vpop.f32.mrb[65].mxu0  ;;  %1533 = vmatprep.subr.bf16.mxu1 %v1892_v53 }
 0x1f2   :  { %v605_v48 = vpop.f32.mrb[66].mxu0  ;;  %v744_v49 = vsel %vm743_vm6, %v2066_v8, %v742_v42  ;;  %v749_v6 = vmul.f32 %v1691_v43, %v664_v14  ;;  %v760_v8 = vand.u32 2147483648, %v2079_v34  ;;  %v797_v42 = vld [vmem:[#allocation7] sm:$0xff]  ;;  %v1651_v43 = vld [vmem:[#allocation8 + $0x8] sm:$0xff]  }
 0x1f3   :  { %v667_v51 = vadd.f32 %v649_v45, %v631_v44  ;;  %v650_v52 = vmul.f32 %v605_v48, %v605_v48  ;;  %v607_v9 = vpop.f32.mrb[67].mxu0  ;;  %v747_v56 = vsel %vm745_vm8, %v746_v50, %v744_v49  ;;  %v800_v44 = vld [vmem:[#allocation7 + $0x18] sm:$0xff]  ;;  %v1652_v45 = vld [vmem:[#allocation8 + $0x10] sm:$0xff]   ;;  %v802_v46 = vld [vmem:[#allocation7 + $0x28] sm:$0xff] }
 0x1f4   :  { %v751_v54 = vsel %vm750_vm7, %v664_v14, %v749_v6  ;;  %v1653_v48 = vld [vmem:[#allocation8 + $0x18] sm:$0xff]   ;;  %v803_v50 = vld [vmem:[#allocation7 + $0x30] sm:$0xff]  ;;  %v1658_v6 = vld [vmem:[#allocation10] sm:$0xff]  }
 0x1f5   :  { %1696 = vrsqrt.f32 %v667_v51  ;;  %v668_v55 = vadd.f32 %v650_v52, %v632_v47  ;;  %v754_v57 = vsel %vm752_vm9, %v753_v19, %v751_v54  ;;  %vm771_vm14 = vcmp.eq.f32.partialorder %v667_v51, inf  ;;  %v801_v47 = vld [vmem:[#allocation7 + $0x20] sm:$0xff]  ;;  %v804_v49 = vld [vmem:[#allocation7 + $0x38] sm:$0xff]  ;;  %v1655_v52 = vld [vmem:[#allocation8 + $0x28] sm:$0xff]  }
 0x1f6   :  { %v1534_v21 = vpack.c.bf16 %v754_v57, %v747_v56  ;;  %v774_v28 = vand.u32 2147483648, %v667_v51  ;;  %vm773_vm1 = vcmp.eq.f32.partialorder %v667_v51, 0.0  ;;  %v1656_v9 = vld [vmem:[#allocation8 + $0x30] sm:$0xff]   ;;  %v1657_v19 = vld [vmem:[#allocation8 + $0x38] sm:$0xff]   ;;  %v1659_v54 = vld [vmem:[#allocation10 + $0x8] sm:$0xff]  }
 0x1f7   :  { %v1693_v58 = vpop.eup %1692  ;;  %1698 = vrsqrt.f32 %v668_v55  ;;  %vm778_vm15 = vcmp.eq.f32.partialorder %v668_v55, inf  ;;  %v781_v29 = vand.u32 2147483648, %v668_v55  ;;  %vm780_vm2 = vcmp.eq.f32.partialorder %v668_v55, 0.0  ;;  %v1661_v56 = vld [vmem:[#allocation10 + $0x18] sm:$0xff]   ;;  %v1662_v57 = vld [vmem:[#allocation10 + $0x20] sm:$0xff]  }
 0x1f8   :  { %v610_v59 = vpop.f32.mrb[68].mxu0  ;;  %1535 = vmatpush1.bf16.msra.mxu1 %v1534_v21  ;;  %v756_v61 = vmul.f32 %v1693_v58, %v2079_v34  ;;  %v1663_v21 = vld [vmem:[#allocation10 + $0x28] sm:$0xff]   ;;  %v1664_v58 = vld [vmem:[#allocation10 + $0x30] sm:$0xff]  }
 0x1f9   :  { %v1695_v63 = vpop.eup %1694  ;;  %v651_v1 = vmul.f32 %v610_v59, %v610_v59  ;;  %v612_v3 = vpop.f32.mrb[69].mxu0  ;;  %1536 = vmatprep.subr.bf16.mxu1 %v1892_v53  ;;  %v1665_v59 = vld [vmem:[#allocation10 + $0x38] sm:$0xff]  }
 0x1fa   :  { %v613_v5 = vpop.f32.mrb[70].mxu0  ;;  %v758_v7 = vsel %vm757_vm10, %v2079_v34, %v756_v61  ;;  %v763_v0 = vmul.f32 %v1695_v63, %v666_v37  ;;  %v1666_v61 = vld [vmem:[#allocation10 + $0x40] sm:$0xff]   ;;  %v1667_v63 = vld [vmem:[#allocation10 + $0x48] sm:$0xff]  }
 0x1fb   :  { %v669_v10 = vadd.f32 %v651_v1, %v633_v60  ;;  %v652_v11 = vmul.f32 %v613_v5, %v613_v5  ;;  %v615_v12 = vpop.f32.mrb[71].mxu0  ;;  %v761_v16 = vsel %vm759_vm12, %v760_v8, %v758_v7  ;;  %v1222_v60 = vld [vmem:[%s2151_s5] sm:$0xff] }
 0x1fc   :  { %v765_v14 = vsel %vm764_vm11, %v666_v37, %v763_v0 }
 0x1fd   :  { %1700 = vrsqrt.f32 %v669_v10  ;;  %v670_v13 = vadd.f32 %v652_v11, %v634_v62  ;;  %v768_v18 = vsel %vm766_vm13, %v767_v23, %v765_v14  ;;  %vm785_vm3 = vcmp.eq.f32.partialorder %v669_v10, inf }
 0x1fe   :  { %v1537_v25 = vpack.c.bf16 %v768_v18, %v761_v16  ;;  %v788_v4 = vand.u32 2147483648, %v669_v10  ;;  %vm787_vm5 = vcmp.eq.f32.partialorder %v669_v10, 0.0 }
 0x1ff   :  { %v1697_v20 = vpop.eup %1696  ;;  %1702 = vrsqrt.f32 %v670_v13  ;;  %vm792_vm4 = vcmp.eq.f32.partialorder %v670_v13, inf  ;;  %v795_v37 = vand.u32 2147483648, %v670_v13  ;;  %vm794_vm6 = vcmp.eq.f32.partialorder %v670_v13, 0.0 }
 0x200   :  { %1538 = vmatpush1.bf16.msra.mxu1 %v1537_v25  ;;  %v770_v22 = vmul.f32 %v1697_v20, %v667_v51 }
 0x201   :  { %v1699_v24 = vpop.eup %1698  ;;  %1539 = vmatprep.subr.bf16.mxu1 %v1892_v53 }
 0x202   :  { %v772_v26 = vsel %vm771_vm14, %v667_v51, %v770_v22  ;;  %v777_v27 = vmul.f32 %v1699_v24, %v668_v55  ;;  %v1654_v51 = vld [vmem:[#allocation8 + $0x20] sm:$0xff]  }
 0x203   :  { %v775_v31 = vsel %vm773_vm1, %v774_v28, %v772_v26 }
 0x204   :  { %v779_v30 = vsel %vm778_vm15, %v668_v55, %v777_v27  ;;  %v1660_v55 = vld [vmem:[#allocation10 + $0x10] sm:$0xff]  }
 0x205   :  { %v782_v32 = vsel %vm780_vm2, %v781_v29, %v779_v30 }
 0x206   :  { %v1540_v2 = vpack.c.bf16 %v782_v32, %v775_v31 }
 0x207   :  { %v1701_v33 = vpop.eup %1700 }
 0x208   :  { %1541 = vmatpush1.bf16.msra.mxu1 %v1540_v2  ;;  %v784_v34 = vmul.f32 %v1701_v33, %v669_v10 }
 0x209   :  { %v1703_v35 = vpop.eup %1702  ;;  %1542 = vmatprep.subr.bf16.mxu1 %v1892_v53  ;;  %v799_v53 = vld [vmem:[#allocation7 + $0x10] sm:$0xff] }
 0x20a   :  { %v786_v36 = vsel %vm785_vm3, %v669_v10, %v784_v34  ;;  %v791_v15 = vmul.f32 %v1703_v35, %v670_v13 }
 0x20b   :  { %v789_v38 = vsel %vm787_vm5, %v788_v4, %v786_v36 }
 0x20c   :  { %v793_v17 = vsel %vm792_vm4, %v670_v13, %v791_v15 }
 0x20d   :  { %v796_v39 = vsel %vm794_vm6, %v795_v37, %v793_v17 }
 0x20e   :  { %v1543_v41 = vpack.c.bf16 %v796_v39, %v789_v38 }
 0x210   :  { %1544 = vmatpush1.bf16.msra.mxu1 %v1543_v41 }
 0x211   :  { %1459 = vmatprep.subr.bf16.mxu1 %v1650_v40 }
 0x213   :  { %883 = vmatmul.mubr.f32.vlgmr.msra.gmra.mrb[0].mxu1 %v797_v42 }
 0x214   :  { %1460 = vmatpush3.bf16.msra.mxu1 %v1650_v40  ;;  %1406 = vmatprep.mubr.msk.f32.mxu1 %vm805_vm0, %v800_v44 }
 0x215   :  { %1461 = vmatprep.subr.bf16.mxu1 %v1651_v43 }
 0x217   :  { %888 = vmatmul.mubr.f32.gmra.mrb[2].mxu1 %v799_v53 }
 0x218   :  { %1462 = vmatpush3.bf16.msra.mxu1 %v1651_v43  ;;  %1407 = vmatprep.mubr.msk.f32.mxu1 %vm805_vm0, %v802_v46 }
 0x219   :  { %1463 = vmatprep.subr.bf16.mxu1 %v1652_v45 }
 0x21b   :  { %893 = vmatmul.mubr.f32.gmra.mrb[4].mxu1 %v801_v47 }
 0x21c   :  { %1464 = vmatpush3.bf16.msra.mxu1 %v1652_v45  ;;  %1408 = vmatprep.mubr.msk.f32.mxu1 %vm805_vm0, %v804_v49  ;;  %vm1224_vm0 = vcmask 654336  }
 0x21d   :  { %1465 = vmatprep.subr.bf16.mxu1 %v1653_v48 }
 0x21f   :  { %898 = vmatmul.mubr.f32.gmra.mrb[6].mxu1 %v803_v50 }
 0x220   :  { %1466 = vmatpush3.bf16.msra.mxu1 %v1653_v48  ;;  %1475 = vmatprep.mubr.bf16.mxu1 %v1658_v6 }
 0x221   :  { %1467 = vmatprep.subr.bf16.mxu1 %v1654_v51 }
 0x224   :  { %1468 = vmatpush3.bf16.msra.mxu1 %v1654_v51 }
 0x225   :  { %1469 = vmatprep.subr.bf16.mxu1 %v1655_v52 }
 0x228   :  { %1470 = vmatpush3.bf16.msra.mxu1 %v1655_v52 }
 0x229   :  { %1471 = vmatprep.subr.bf16.mxu1 %v1656_v9 }
 0x22c   :  { %1472 = vmatpush3.bf16.msra.mxu1 %v1656_v9 }
 0x22d   :  { %1473 = vmatprep.subr.bf16.mxu1 %v1657_v19 }
 0x230   :  { %1474 = vmatpush3.bf16.msra.mxu1 %v1657_v19 }
 0x233   :  { %1476 = vmatmul.mubr.bf16.vlgmr.msra.gmra.mrb[8].mxu1 %v1659_v54 }
 0x234   :  { %1479 = vmatprep.mubr.bf16.mxu1 %v1660_v55 }
 0x23b   :  { %1480 = vmatmul.mubr.bf16.gmra.mrb[12].mxu1 %v1661_v56 }
 0x23c   :  { %1483 = vmatprep.mubr.bf16.mxu1 %v1662_v57 }
 0x243   :  { %1484 = vmatmul.mubr.bf16.gmra.mrb[16].mxu1 %v1663_v21 }
 0x244   :  { %1487 = vmatprep.mubr.bf16.mxu1 %v1664_v58 }
 0x24b   :  { %1488 = vmatmul.mubr.bf16.gmra.mrb[20].mxu1 %v1665_v59 }
 0x24c   :  { %1491 = vmatprep.mubr.bf16.mxu1 %v1666_v61 }
 0x253   :  { %1492 = vmatmul.mubr.bf16.gmra.mrb[24].mxu1 %v1667_v63 }
 0x254   :  { %1515 = vmatprep.mubr.msk.f32.mxu1 %vm1224_vm0, %v1222_v60 }
 0x2e6   :  { %v884_v1 = vpop.f32.mrb[0].mxu1 }
 0x2e7   :  { %v903_v3 = vmax.f32 %v884_v1, 1e-05  ;;  %v886_v62 = vpop.f32.mrb[1].mxu1 }
 0x2e9   :  { %1704 = vlog2.f32 %v903_v3 }
 0x2ea   :  { %v889_v5 = vpop.f32.mrb[2].mxu1 }
 0x2eb   :  { %v904_v7 = vmax.f32 %v889_v5, 1e-05  ;;  %v891_v8 = vpop.f32.mrb[3].mxu1 }
 0x2ed   :  { %1706 = vlog2.f32 %v904_v7 }
 0x2ee   :  { %v894_v0 = vpop.f32.mrb[4].mxu1 }
 0x2ef   :  { %v905_v10 = vmax.f32 %v894_v0, 1e-05  ;;  %v896_v11 = vpop.f32.mrb[5].mxu1 }
 0x2f1   :  { %1708 = vlog2.f32 %v905_v10 }
 0x2f2   :  { %v899_v12 = vpop.f32.mrb[6].mxu1 }
 0x2f3   :  { %v1705_v23 = vpop.eup %1704  ;;  %v906_v14 = vmax.f32 %v899_v12, 1e-05  ;;  %v901_v13 = vpop.f32.mrb[7].mxu1 }
 0x2f4   :  { %v908_v16 = vmul.f32 0.6931472, %v1705_v23 }
 0x2f5   :  { %1710 = vlog2.f32 %v906_v14 }
 0x2f6   :  { %v915_v18 = vmul.f32 0.4342945, %v908_v16 }
 0x2f7   :  { %v1707_v25 = vpop.eup %1706 }
 0x2f8   :  { %v919_v20 = vmul.f32 20.0, %v915_v18  ;;  %v910_v22 = vmul.f32 0.6931472, %v1707_v25 }
 0x2fa   :  { %v923_v24 = vmax.f32 %v919_v20, -50.0  ;;  %v916_v26 = vmul.f32 0.4342945, %v910_v22 }
 0x2fb   :  { %v1709_v27 = vpop.eup %1708 }
 0x2fc   :  { %v927_v28 = vmin.f32 %v923_v24, 80.0  ;;  %v920_v29 = vmul.f32 20.0, %v916_v26  ;;  %v912_v30 = vmul.f32 0.6931472, %v1709_v27 }
 0x2fe   :  { %931 = vst [vmem:[#allocation11] sm:$0xff] %v927_v28  ;;  %v924_v31 = vmax.f32 %v920_v29, -50.0  ;;  %v917_v32 = vmul.f32 0.4342945, %v912_v30 }
 0x2ff   :  { %v1711_v2 = vpop.eup %1710 }
 0x300   :  { %v928_v33 = vmin.f32 %v924_v31, 80.0  ;;  %v921_v34 = vmul.f32 20.0, %v917_v32  ;;  %v914_v35 = vmul.f32 0.6931472, %v1711_v2 }
 0x302   :  { %932 = vst [vmem:[#allocation11 + $0x8] sm:$0xff] %v928_v33  ;;  %v925_v36 = vmax.f32 %v921_v34, -50.0  ;;  %v918_v15 = vmul.f32 0.4342945, %v914_v35  ;;  %v1223_v33 = vld [vmem:[%s2151_s5 + $0x8] sm:$0xff] }
 0x304   :  { %v929_v4 = vmin.f32 %v925_v36, 80.0  ;;  %v922_v37 = vmul.f32 20.0, %v918_v15 }
 0x306   :  { %933 = vst [vmem:[#allocation11 + $0x10] sm:$0xff] %v929_v4  ;;  %v926_v17 = vmax.f32 %v922_v37, -50.0  ;;  %v1477_v38 = vpop.f32.mrb[8].mxu1 }
 0x307   :  { %v1113_v39 = vpop.f32.mrb[9].mxu1  ;;  %v1194_v58 = vmul.f32 %v1477_v38, %v1477_v38 }
 0x308   :  { %v930_v40 = vmin.f32 %v926_v17, 80.0  ;;  %v1478_v41 = vpop.f32.mrb[10].mxu1  ;;  %v1192_v47 = vmul.f32 %v1113_v39, %v1113_v39 }
 0x309   :  { %v1116_v42 = vpop.f32.mrb[11].mxu1  ;;  %v1195_v62 = vmul.f32 %v1478_v41, %v1478_v41 }
 0x30a   :  { %934 = vst [vmem:[#allocation11 + $0x18] sm:$0xff] %v930_v40  ;;  %v1193_v6 = vmul.f32 %v1116_v42, %v1116_v42 }
 0x30e   :  { %v1481_v43 = vpop.f32.mrb[12].mxu1 }
 0x30f   :  { %v1129_v44 = vpop.f32.mrb[13].mxu1  ;;  %v1198_v16 = vmul.f32 %v1481_v43, %v1481_v43 }
 0x310   :  { %v1482_v53 = vpop.f32.mrb[14].mxu1  ;;  %v1196_v56 = vmul.f32 %v1129_v44, %v1129_v44 }
 0x311   :  { %v1132_v45 = vpop.f32.mrb[15].mxu1  ;;  %v1199_v27 = vmul.f32 %v1482_v53, %v1482_v53 }
 0x312   :  { %v1197_v63 = vmul.f32 %v1132_v45, %v1132_v45 }
 0x316   :  { %v1485_v46 = vpop.f32.mrb[16].mxu1 }
 0x317   :  { %v1202_v48 = vmul.f32 %v1485_v46, %v1485_v46  ;;  %v1145_v49 = vpop.f32.mrb[17].mxu1 }
 0x318   :  { %v1486_v50 = vpop.f32.mrb[18].mxu1  ;;  %v1200_v23 = vmul.f32 %v1145_v49, %v1145_v49 }
 0x319   :  { %v1212_v51 = vadd.f32 %v1202_v48, %v1192_v47  ;;  %v1203_v52 = vmul.f32 %v1486_v50, %v1486_v50  ;;  %v1148_v9 = vpop.f32.mrb[19].mxu1 }
 0x31a   :  { %v1201_v20 = vmul.f32 %v1148_v9, %v1148_v9 }
 0x31b   :  { %v1213_v19 = vadd.f32 %v1203_v52, %v1193_v6 }
 0x31d   :  { %v1545_v54 = vpack.c.bf16 %v1213_v19, %v1212_v51 }
 0x31e   :  { %v1489_v55 = vpop.f32.mrb[20].mxu1 }
 0x31f   :  { %v1206_v57 = vmul.f32 %v1489_v55, %v1489_v55  ;;  %v1161_v21 = vpop.f32.mrb[21].mxu1  ;;  %1546 = vmatprep.subr.bf16.mxu1 %v1545_v54 }
 0x320   :  { %v1204_v59 = vmul.f32 %v1161_v21, %v1161_v21  ;;  %v1490_v61 = vpop.f32.mrb[22].mxu1  ;;  %1548 = vmatpush3.bf16.msra.mxu1 %v1545_v54 }
 0x321   :  { %v1216_v60 = vadd.f32 %v1206_v57, %v1196_v56  ;;  %v1207_v1 = vmul.f32 %v1490_v61, %v1490_v61  ;;  %v1164_v3 = vpop.f32.mrb[23].mxu1 }
 0x322   :  { %v1214_v5 = vadd.f32 %v1204_v59, %v1194_v58  ;;  %v1205_v7 = vmul.f32 %v1164_v3, %v1164_v3 }
 0x323   :  { %v1217_v8 = vadd.f32 %v1207_v1, %v1197_v63 }
 0x324   :  { %v1215_v0 = vadd.f32 %v1205_v7, %v1195_v62 }
 0x325   :  { %v1553_v10 = vpack.c.bf16 %v1217_v8, %v1216_v60 }
 0x326   :  { %v1493_v11 = vpop.f32.mrb[24].mxu1  ;;  %v1549_v12 = vpack.c.bf16 %v1215_v0, %v1214_v5 }
 0x327   :  { %v1210_v14 = vmul.f32 %v1493_v11, %v1493_v11  ;;  %v1177_v13 = vpop.f32.mrb[25].mxu1 }
 0x328   :  { %v1208_v18 = vmul.f32 %v1177_v13, %v1177_v13  ;;  %v1494_v25 = vpop.f32.mrb[26].mxu1  ;;  %1550 = vmatprep.subr.bf16.mxu1 %v1549_v12 }
 0x329   :  { %v1220_v22 = vadd.f32 %v1210_v14, %v1200_v23  ;;  %v1211_v24 = vmul.f32 %v1494_v25, %v1494_v25  ;;  %v1180_v26 = vpop.f32.mrb[27].mxu1  ;;  %1552 = vmatpush3.bf16.msra.mxu1 %v1549_v12 }
 0x32a   :  { %v1218_v28 = vadd.f32 %v1208_v18, %v1198_v16  ;;  %v1209_v29 = vmul.f32 %v1180_v26, %v1180_v26  ;;  %1554 = vmatprep.subr.bf16.mxu1 %v1553_v10 }
 0x32b   :  { %v1221_v30 = vadd.f32 %v1211_v24, %v1201_v20 }
 0x32c   :  { %v1219_v31 = vadd.f32 %v1209_v29, %v1199_v27 }
 0x32d   :  { %1556 = vmatpush3.bf16.msra.mxu1 %v1553_v10  ;;  %v1561_v32 = vpack.c.bf16 %v1221_v30, %v1220_v22 }
 0x32e   :  { %v1557_v2 = vpack.c.bf16 %v1219_v31, %v1218_v28 }
 0x330   :  { %1558 = vmatprep.subr.bf16.mxu1 %v1557_v2 }
 0x331   :  { %1560 = vmatpush3.bf16.msra.mxu1 %v1557_v2 }
 0x332   :  { %1562 = vmatprep.subr.bf16.mxu1 %v1561_v32 }
 0x335   :  { %1564 = vmatpush3.bf16.msra.mxu1 %v1561_v32 }
 0x338   :  { %1516 = vmatmul.mubr.msk.f32.vlgmr.msra.gmra.mrb[28].mxu1 %vm1224_vm0, %v1223_v33 }
 0x339   :  { %1837 = shalt.err (!%p1834_p2)
}
 0x33a   :  { %s1838_s29 = scalar_lea.hbm %s2152_s6, 512 }
 0x33b   :  { %p1839_p3 = scmp.ne.s32.totalorder %s2152_s6, %s1838_s29  ;;  %p1842_p4 = scmp.lt.u32.totalorder %s1838_s29, %s2152_s6 }
 0x33d   :  { %p1844_p5 = pnand %p1842_p4, %p1839_p3 }
 0x33f   :  { %1847 = shalt.err (!%p1844_p5)
}
 0x340   :  { %1329 = dma.vmem_to_hbm [thread:$0]  %s1324_s24, 512, %s2152_s6, [#allocation4], %s1881_s11, %s1881_s11, %s1882_s12  }
 0x341   :  { %s1894_s10 = smov [#allocation12]  }
 0x342   :  { %s1335_s13 = sshll.u32 %s1894_s10, 4  ;;  %s1336_s13 = int_to_ptr.vmem [resolvable:$true] %s1335_s13 }
 0x343   :  { %s1848_s6 = scalar_lea.vmem %s1336_s13, 256  ;;  %p1853_p7 = scmp.lt.s32.totalorder %s1336_s13, %s1336_s13 }
 0x344   :  { %p1849_p6 = scmp.ne.s32.totalorder %s1336_s13, %s1848_s6  ;;  %p1854_p8 = scmp.lt.s32.totalorder %s1848_s6, %s1848_s6 }
 0x346   :  { %p1855_p9 = por %p1854_p8, %p1853_p7 }
 0x348   :  { %p1856_p10 = pnand %p1855_p9, %p1849_p6 }
 0x40b   :  { %v1517_v34 = vpop.f32.mrb[28].mxu1 }
 0x40c   :  { %v1307_v35 = vmax.f32 %v1517_v34, 1e-10  ;;  %v1297_v36 = vpop.f32.mrb[29].mxu1 }
 0x40d   :  { %v1306_v15 = vmax.f32 %v1297_v36, 1e-10 }
 0x40e   :  { %1712 = vlog2.f32 %v1307_v35 }
 0x40f   :  { %1714 = vlog2.f32 %v1306_v15 }
 0x418   :  { %v1713_v4 = vpop.eup %1712 }
 0x419   :  { %v1715_v37 = vpop.eup %1714  ;;  %v1311_v17 = vmul.f32 0.6931472, %v1713_v4 }
 0x41a   :  { %v1309_v38 = vmul.f32 0.6931472, %v1715_v37 }
 0x41b   :  { %v1313_v39 = vmul.f32 0.4342945, %v1311_v17 }
 0x41c   :  { %v1312_v40 = vmul.f32 0.4342945, %v1309_v38 }
 0x41d   :  { %v1315_v41 = vmul.f32 10.0, %v1313_v39 }
 0x41e   :  { %v1314_v42 = vmul.f32 10.0, %v1312_v40 }
 0x41f   :  { %1317 = vst [vmem:[#allocation12 + $0x8] sm:$0xff] %v1315_v41 }
 0x420   :  { %1316 = vst [vmem:[#allocation12] sm:$0xff] %v1314_v42 }
 0x421   :  { %1859 = shalt.err (!%p1856_p10)
}
 0x422   :  { %s1860_s17 = scalar_lea.hbm %s2153_s7, 256 }
 0x423   :  { %p1861_p11 = scmp.ne.s32.totalorder %s2153_s7, %s1860_s17  ;;  %p1864_p12 = scmp.lt.u32.totalorder %s1860_s17, %s2153_s7 }
 0x425   :  { %p1866_p13 = pnand %p1864_p12, %p1861_p11 }
 0x427   :  { %1869 = shalt.err (!%p1866_p13)
}
 0x428   :  { %1341 = dma.vmem_to_hbm [thread:$0]  %s1336_s13, 256, %s2153_s7, [#allocation13], %s1881_s11, %s1881_s11, %s1882_s12  }
 0x429   :  { %1876 = dma.done.wait [#allocation4], 512  }
 0x42a   :  { %1877 = vsyncadd [#allocation4], 4294966784 }
 0x42b   :  { %1878 = dma.done.wait [#allocation13], 256  }
 0x42c   :  { %1879 = vsyncadd [#allocation13], 4294967040 }
 0x42d   :  { %1348 = vsyncpa [#allocation3], 1 }
 0x42e   :  { %1349 = vsyncpa [#allocation6], 1 }
 0x42f   :  { %1350 = vsyncpa [#allocation9], 1 }
 0x430   :  { %1351 = vsyncpa [#allocation4], 1 }
 0x431   :  { %1352 = vsyncpa [#allocation13], 1 }

</bundles_post_ra>
